<compile_context>
chip_gen: v7x
topology: tpu7x:2x2x1
jax: 0.10.0
libtpu: 0.0.40
codegen_flags: <defaults>
</compile_context>

<pallas_src>
import math

import numpy as np
import jax
import jax.numpy as jnp
from jax.experimental import pallas as pl
from jax.experimental.pallas import tpu as pltpu


def _round_up(n, m):
    return ((n + m - 1) // m) * m


def _outer_fm_kernel(x_ref, w1g_ref, w2g_ref, o_ref):
    # x_ref  : [tm, head_dim]      (streamed per grid step)
    # w1g_ref: [head_dim, T]       (VMEM-resident, triu-row-gathered W1^T)
    # w2g_ref: [head_dim, T]       (VMEM-resident, triu-col-gathered W2^T)
    # o_ref  : [tm, T]
    x = x_ref[...]
    ya = jnp.dot(x, w1g_ref[...], preferred_element_type=jnp.float32)
    yb = jnp.dot(x, w2g_ref[...], preferred_element_type=jnp.float32)
    o_ref[...] = (ya * yb).astype(o_ref.dtype)


def learnable_outer_product_feature_map(x, weight1, weight2, *, block_rows=1024):
    """Pallas implementation of LearnableOuterProductFeatureMap.forward.

    x       : [..., head_dim]
    weight1 : [feature_dim, head_dim]   (nn.Linear, bias=False)
    weight2 : [feature_dim, head_dim]
    returns : [..., feature_dim * (feature_dim + 1) // 2]
    """
    head_dim = x.shape[-1]
    feature_dim = weight1.shape[0]
    lead_shape = x.shape[:-1]
    M = int(math.prod(lead_shape)) if lead_shape else 1

    # Upper-triangular (incl. diagonal) index pairs, row-major ordering —
    # identical to torch.triu_indices(N, N).
    iu, ju = np.triu_indices(feature_dim)
    T = int(iu.shape[0])

    # Fold the triu gather into the weights (once, at trace time, outside the
    # kernel hot path).
    w1g = weight1[iu, :].T        # [head_dim, T]
    w2g = weight2[ju, :].T        # [head_dim, T]

    x2d = x.reshape(M, head_dim)

    # Dtype-aware sublane multiple (8 for f32, 16 for bf16, 32 for int8/fp8).
    itemsize = jnp.dtype(x.dtype).itemsize
    sublane = max(8, 32 // max(itemsize, 1))

    # Tile the token axis; pad M so every grid step sees a full tile (no
    # partial last block, no masked row stores).
    tm = min(block_rows, _round_up(M, sublane))
    m_pad = _round_up(M, tm)
    if m_pad != M:
        x2d = jnp.pad(x2d, ((0, m_pad - M), (0, 0)))

    grid = (m_pad // tm,)

    out2d = pl.pallas_call(
        _outer_fm_kernel,
        out_shape=jax.ShapeDtypeStruct((m_pad, T), x.dtype),
        grid_spec=pltpu.PrefetchScalarGridSpec(
            num_scalar_prefetch=0,
            grid=grid,
            in_specs=[
                pl.BlockSpec((tm, head_dim), lambda i: (i, 0)),   # streamed rows
                pl.BlockSpec((head_dim, T), lambda i: (0, 0)),    # VMEM-resident
                pl.BlockSpec((head_dim, T), lambda i: (0, 0)),    # VMEM-resident
            ],
            out_specs=pl.BlockSpec((tm, T), lambda i: (i, 0)),
        ),
        compiler_params=pltpu.CompilerParams(
            dimension_semantics=("parallel",),   # megacore-shardable row tiles
        ),
    )(x2d, w1g, w2g)

    if m_pad != M:
        out2d = out2d[:M]
    return out2d.reshape(*lead_shape, T)


def init_params(key, head_dim, feature_dim, dtype=jnp.float32):
    """nn.Linear(bias=False) init: U(-1/sqrt(fan_in), 1/sqrt(fan_in))."""
    k1, k2 = jax.random.split(key)
    bound = 1.0 / math.sqrt(head_dim)
    w1 = jax.random.uniform(k1, (feature_dim, head_dim), dtype, -bound, bound)
    w2 = jax.random.uniform(k2, (feature_dim, head_dim), dtype, -bound, bound)
    return w1, w2


if __name__ == "__main__":
    key = jax.random.PRNGKey(0)
    k_x, k_p = jax.random.split(key)

    # Small shapes consistent with the module: x is [batch, heads, seq, head_dim].
    batch, heads, seq, head_dim = 2, 4, 8, 32
    feature_dim = 16
    T = feature_dim * (feature_dim + 1) // 2        # 136

    x = jax.random.normal(k_x, (batch, heads, seq, head_dim), jnp.float32)
    w1, w2 = init_params(k_p, head_dim, feature_dim)

    out = learnable_outer_product_feature_map(x, w1, w2)
    out = jax.block_until_ready(out)

    # Plain-JAX reference: layer1(x), layer2(x), outer product, triu-flatten.
    a = jnp.einsum("bhsd,fd->bhsf", x, w1)
    b = jnp.einsum("bhsd,fd->bhsf", x, w2)
    z = a[..., :, None] * b[..., None, :]
    iu, ju = np.triu_indices(feature_dim)
    ref = z[..., iu, ju]

    assert out.shape == (batch, heads, seq, T), out.shape
    assert jnp.allclose(out, ref, atol=1e-4, rtol=1e-4), float(
        jnp.max(jnp.abs(out - ref)))

    print("KERNEL_OK")
</pallas_src>

<mosaic_0001>
module attributes {stable_mosaic.version = 11 : i64} {
  func.func @_outer_fm_kernel(%arg0: i32, %arg1: memref<64x32xf32, #tpu.memory_space<vmem>>, %arg2: memref<32x136xf32, #tpu.memory_space<vmem>>, %arg3: memref<32x136xf32, #tpu.memory_space<vmem>>, %arg4: memref<64x136xf32, #tpu.memory_space<vmem>>) attributes {dimension_semantics = [#tpu.dimension_semantics<parallel>], iteration_bounds = array<i64: 1>, scalar_prefetch = 0 : i64, scratch_operands = 0 : i64, tpu.core_type = #tpu.core_type<tc>, window_params = [{transform_indices = @transform_0, window_bounds = array<i64: 64, 32>}, {pipeline_mode = #tpu.pipeline_mode<synchronous>, transform_indices = @transform_1, window_bounds = array<i64: 32, 136>}, {pipeline_mode = #tpu.pipeline_mode<synchronous>, transform_indices = @transform_2, window_bounds = array<i64: 32, 136>}, {transform_indices = @transform_3, window_bounds = array<i64: 64, 136>}]} {
    %c0 = arith.constant 0 : index
    %c0_0 = arith.constant 0 : index
    %0 = vector.load %arg1[%c0, %c0_0] : memref<64x32xf32, #tpu.memory_space<vmem>>, vector<64x32xf32>
    %c0_1 = arith.constant 0 : index
    %c0_2 = arith.constant 0 : index
    %1 = vector.load %arg2[%c0_1, %c0_2] : memref<32x136xf32, #tpu.memory_space<vmem>>, vector<32x136xf32>
    %cst = arith.constant dense<0.000000e+00> : vector<64x136xf32>
    %2 = tpu.matmul %0, %1, %cst {dimension_numbers = #tpu.dot_dimension_numbers<[1], [0], [0], [1], [0, 0, 1, 1], [], []>} : vector<64x32xf32>, vector<32x136xf32>, vector<64x136xf32> -> vector<64x136xf32>
    %c0_3 = arith.constant 0 : index
    %c0_4 = arith.constant 0 : index
    %3 = vector.load %arg3[%c0_3, %c0_4] : memref<32x136xf32, #tpu.memory_space<vmem>>, vector<32x136xf32>
    %cst_5 = arith.constant dense<0.000000e+00> : vector<64x136xf32>
    %4 = tpu.matmul %0, %3, %cst_5 {dimension_numbers = #tpu.dot_dimension_numbers<[1], [0], [0], [1], [0, 0, 1, 1], [], []>} : vector<64x32xf32>, vector<32x136xf32>, vector<64x136xf32> -> vector<64x136xf32>
    %5 = arith.mulf %2, %4 : vector<64x136xf32>
    %c0_6 = arith.constant 0 : index
    %c0_7 = arith.constant 0 : index
    %6 = vector.load %arg4[%c0_6, %c0_7] : memref<64x136xf32, #tpu.memory_space<vmem>>, vector<64x136xf32>
    tpu.vector_store %arg4[%c0_6, %c0_7], %5 {strides = array<i32>} : memref<64x136xf32, #tpu.memory_space<vmem>>, vector<64x136xf32>,
    return
  }
  func.func @transform_0(%arg0: i32) -> (i32, i32) {
    %c0_i32 = arith.constant 0 : i32
    %c0_i32_0 = arith.constant 0 : i32
    return %arg0, %c0_i32 : i32, i32
  }
  func.func @transform_1(%arg0: i32) -> (i32, i32) {
    %c0_i32 = arith.constant 0 : i32
    %c0_i32_0 = arith.constant 0 : i32
    %c0_i32_1 = arith.constant 0 : i32
    return %c0_i32, %c0_i32_0 : i32, i32
  }
  func.func @transform_2(%arg0: i32) -> (i32, i32) {
    %c0_i32 = arith.constant 0 : i32
    %c0_i32_0 = arith.constant 0 : i32
    %c0_i32_1 = arith.constant 0 : i32
    return %c0_i32, %c0_i32_0 : i32, i32
  }
  func.func @transform_3(%arg0: i32) -> (i32, i32) {
    %c0_i32 = arith.constant 0 : i32
    %c0_i32_0 = arith.constant 0 : i32
    return %arg0, %c0_i32 : i32, i32
  }
}

</mosaic_0001>

<bundles_post_ra>
// kernel: tpu_custom_call.1
= control target key start
LH: loop header
LB: loop body
LE: loop exit
PB: predicated region body
PF: predicated region fallthrough
CT: control target
= control target key end

     0   :  { %8 = vsyncpa [#allocation3], 0  ;;  %s582_s0 = inlined_call_operand.vmem [shape: f32[64,32], index: 0, kind: input, shape index: {}]   ;;  %s583_s1 = inlined_call_operand.vmem [shape: f32[32,136], index: 1, kind: input, shape index: {}]   ;;  %s584_s2 = inlined_call_operand.hbm [shape: f32[32,136], index: 2, kind: input, shape index: {}]   ;;  %s585_s3 = inlined_call_operand.hbm [shape: f32[64,136], index: 3, kind: output, shape index: {}]  }
   0x1   :  { %9 = vsyncpa [#allocation4], 0  ;;  %s439_s12 = smov [#allocation2]   ;;  %s391_s16 = scalar_lea.hbm %s584_s2, 1024 }
   0x2   :  { %s19_s13 = sshll.u32 %s439_s12, 4  ;;  %p392_p0 = scmp.ne.s32.totalorder %s584_s2, %s391_s16  ;;  %s20_s13 = int_to_ptr.vmem [resolvable:$true] %s19_s13 }
   0x3   :  { %p395_p1 = scmp.lt.u32.totalorder %s391_s16, %s584_s2 }
   0x5   :  { %p397_p2 = pnand %p395_p1, %p392_p0 }
   0x7   :  { %400 = shalt.err (!%p397_p2)
}
   0x8   :  { %s401_s21 = scalar_lea.vmem %s20_s13, 1024  ;;  %p406_p4 = scmp.lt.s32.totalorder %s20_s13, %s20_s13 }
   0x9   :  { %p402_p3 = scmp.ne.s32.totalorder %s20_s13, %s401_s21  ;;  %p407_p5 = scmp.lt.s32.totalorder %s401_s21, %s401_s21 }
   0xb   :  { %p408_p6 = por %p407_p5, %p406_p4 }
   0xd   :  { %p409_p7 = pnand %p408_p6, %p402_p3 }
   0xf   :  { %412 = shalt.err (!%p409_p7)
}
  0x10   :  { %s440_s22 = smov 256   ;;  %s441_s23 = smov 16  }
  0x11   :  { %25 = dma.hbm_to_vmem [thread:$0]  %s584_s2, 1024, %s20_s13, [#allocation3], %s440_s22, %s440_s22, %s441_s23  }
  0x12   :  { %435 = dma.done.wait [#allocation3], 1024  }
  0x13   :  { %436 = vsyncadd [#allocation3], 4294966272  ;;  %v442_v0 = vmov 0.0   ;;  %v38_v1 = vld [vmem:[%s583_s1 + $0x8] sm:$0xff]  ;;  %v40_v2 = vld [vmem:[%s583_s1 + $0x18] sm:$0xff]  ;;  %vm45_vm0 = vcmask 261120  }
  0x14   :  { %134 = vmatprep.mubr.f32.mxu0 %v442_v0  ;;  %255 = vmatprep.mubr.f32.mxu1 %v442_v0  ;;  %v184_v3 = vld [vmem:[#allocation2 + $0x8] sm:$0xff]  ;;  %v370_v4 = vpack.c.bf16 %v40_v2, %v38_v1  ;;  %v186_v5 = vld [vmem:[#allocation2 + $0x18] sm:$0xff]  ;;  %v37_v6 = vld [vmem:[%s583_s1] sm:$0xff]  ;;  %vm321_vm1 = vcmask 64512  }
  0x15   :  { %v39_v7 = vld [vmem:[%s583_s1 + $0x10] sm:$0xff]  ;;  %v378_v8 = vpack.c.bf16 %v186_v5, %v184_v3  ;;  %v183_v10 = vld [vmem:[#allocation2] sm:$0xff]  ;;  %v42_v12 = vld [vmem:[%s583_s1 + $0x28] sm:$0xff] }
  0x16   :  { %v372_v9 = vpack.c.bf16 %v39_v7, %v37_v6  ;;  %v185_v11 = vld [vmem:[#allocation2 + $0x10] sm:$0xff]  ;;  %371 = vmatprep.subr.bf16.mxu0 %v370_v4  ;;  %v44_v14 = vld [vmem:[%s583_s1 + $0x38] sm:$0xff]  ;;  %v188_v15 = vld [vmem:[#allocation2 + $0x28] sm:$0xff] }
  0x17   :  { %v380_v13 = vpack.c.bf16 %v185_v11, %v183_v10  ;;  %v190_v16 = vld [vmem:[#allocation2 + $0x38] sm:$0xff]  ;;  %379 = vmatprep.subr.bf16.mxu1 %v378_v8  ;;  %v374_v17 = vpack.c.bf16 %v44_v14, %v42_v12  ;;  %v41_v19 = vld [vmem:[%s583_s1 + $0x20] sm:$0xff]  ;;  %v43_v20 = vld [vmem:[%s583_s1 + $0x30] sm:$0xff] }
  0x18   :  { %373 = vmatpush1.bf16.msra.mxu0 %v372_v9  ;;  %v382_v18 = vpack.c.bf16 %v190_v16, %v188_v15  ;;  %v187_v21 = vld [vmem:[#allocation2 + $0x20] sm:$0xff]  ;;  %v376_v22 = vpack.c.bf16 %v43_v20, %v41_v19  ;;  %v189_v23 = vld [vmem:[#allocation2 + $0x30] sm:$0xff]  ;;  %v30_v26 = vld [vmem:[%s582_s0 + $0x8] sm:$0xff] }
  0x19   :  { %381 = vmatpush1.bf16.msra.mxu1 %v380_v13  ;;  %375 = vmatprep.subr.bf16.mxu0 %v374_v17  ;;  %v384_v24 = vpack.c.bf16 %v189_v23, %v187_v21  ;;  %v29_v25 = vld [vmem:[%s582_s0] sm:$0xff]  ;;  %v31_v27 = vld [vmem:[%s582_s0 + $0x10] sm:$0xff]  ;;  %v32_v28 = vld [vmem:[%s582_s0 + $0x18] sm:$0xff] }
  0x1a   :  { %383 = vmatprep.subr.bf16.mxu1 %v382_v18  ;;  %v33_v29 = vld [vmem:[%s582_s0 + $0x20] sm:$0xff]  ;;  %v34_v30 = vld [vmem:[%s582_s0 + $0x28] sm:$0xff]  ;;  %v35_v31 = vld [vmem:[%s582_s0 + $0x30] sm:$0xff] }
  0x1b   :  { %v36_v32 = vld [vmem:[%s582_s0 + $0x38] sm:$0xff]  ;;  %s443_s0 = smov [#allocation5]  }
  0x1c   :  { %377 = vmatpush1.bf16.msra.mxu0 %v376_v22  ;;  %s342_s2 = sshll.u32 %s443_s0, 4  ;;  %s343_s2 = int_to_ptr.vmem [resolvable:$true] %s342_s2 }
  0x1d   :  { %385 = vmatpush1.bf16.msra.mxu1 %v384_v24  ;;  %s413_s4 = scalar_lea.vmem %s343_s2, 2048  ;;  %p418_p9 = scmp.lt.s32.totalorder %s343_s2, %s343_s2 }
  0x1e   :  { %p414_p8 = scmp.ne.s32.totalorder %s343_s2, %s413_s4  ;;  %p419_p10 = scmp.lt.s32.totalorder %s413_s4, %s413_s4 }
  0x1f   :  { %354 = vmatmul.mubr.msk.f32.vlgmr.msra.gmra.mrb[0].mxu0 %vm45_vm0, %v29_v25 }
  0x20   :  { %362 = vmatmul.mubr.msk.f32.vlgmr.msra.gmra.mrb[0].mxu1 %vm45_vm0, %v29_v25  ;;  %140 = vmatprep.mubr.f32.mxu0 %v442_v0  ;;  %p420_p11 = por %p419_p10, %p418_p9 }
  0x21   :  { %261 = vmatprep.mubr.f32.mxu1 %v442_v0 }
  0x22   :  { %p421_p12 = pnand %p420_p11, %p414_p8 }
  0x23   :  { %355 = vmatmul.mubr.msk.f32.gmra.mrb[2].mxu0 %vm45_vm0, %v30_v26 }
  0x24   :  { %363 = vmatmul.mubr.msk.f32.gmra.mrb[2].mxu1 %vm45_vm0, %v30_v26  ;;  %146 = vmatprep.mubr.f32.mxu0 %v442_v0 }
  0x25   :  { %267 = vmatprep.mubr.f32.mxu1 %v442_v0 }
  0x27   :  { %356 = vmatmul.mubr.msk.f32.gmra.mrb[4].mxu0 %vm45_vm0, %v31_v27 }
  0x28   :  { %364 = vmatmul.mubr.msk.f32.gmra.mrb[4].mxu1 %vm45_vm0, %v31_v27  ;;  %152 = vmatprep.mubr.f32.mxu0 %v442_v0 }
  0x29   :  { %273 = vmatprep.mubr.f32.mxu1 %v442_v0 }
  0x2b   :  { %357 = vmatmul.mubr.msk.f32.gmra.mrb[6].mxu0 %vm45_vm0, %v32_v28 }
  0x2c   :  { %365 = vmatmul.mubr.msk.f32.gmra.mrb[6].mxu1 %vm45_vm0, %v32_v28  ;;  %158 = vmatprep.mubr.f32.mxu0 %v442_v0 }
  0x2d   :  { %279 = vmatprep.mubr.f32.mxu1 %v442_v0 }
  0x2f   :  { %358 = vmatmul.mubr.msk.f32.gmra.mrb[8].mxu0 %vm45_vm0, %v33_v29 }
  0x30   :  { %366 = vmatmul.mubr.msk.f32.gmra.mrb[8].mxu1 %vm45_vm0, %v33_v29  ;;  %164 = vmatprep.mubr.f32.mxu0 %v442_v0 }
  0x31   :  { %285 = vmatprep.mubr.f32.mxu1 %v442_v0 }
  0x33   :  { %359 = vmatmul.mubr.msk.f32.gmra.mrb[10].mxu0 %vm45_vm0, %v34_v30 }
  0x34   :  { %367 = vmatmul.mubr.msk.f32.gmra.mrb[10].mxu1 %vm45_vm0, %v34_v30  ;;  %170 = vmatprep.mubr.f32.mxu0 %v442_v0 }
  0x35   :  { %291 = vmatprep.mubr.f32.mxu1 %v442_v0 }
  0x37   :  { %360 = vmatmul.mubr.msk.f32.gmra.mrb[12].mxu0 %vm45_vm0, %v35_v31 }
  0x38   :  { %368 = vmatmul.mubr.msk.f32.gmra.mrb[12].mxu1 %vm45_vm0, %v35_v31  ;;  %176 = vmatprep.mubr.f32.mxu0 %v442_v0 }
  0x39   :  { %297 = vmatprep.mubr.f32.mxu1 %v442_v0 }
  0x3b   :  { %361 = vmatmul.mubr.msk.f32.gmra.mrb[14].mxu0 %vm45_vm0, %v36_v32 }
  0x3c   :  { %369 = vmatmul.mubr.msk.f32.gmra.mrb[14].mxu1 %vm45_vm0, %v36_v32 }
  0xf2   :  { %v136_v33 = vpop.f32.mrb[0].mxu0 }
  0xf3   :  { %v257_v34 = vpop.f32.mrb[0].mxu1  ;;  %v138_v35 = vpop.f32.mrb[1].mxu0 }
  0xf4   :  { %v304_v36 = vmul.f32 %v257_v34, %v136_v33  ;;  %v259_v37 = vpop.f32.mrb[1].mxu1 }
  0xf5   :  { %v305_v38 = vmul.f32 %v259_v37, %v138_v35 }
  0xf6   :  { %320 = vst [vmem:[#allocation5] sm:$0xff] %v304_v36  ;;  %v142_v39 = vpop.f32.mrb[2].mxu0 }
  0xf7   :  { %322 = vst.msk [vmem:[#allocation5 + $0x8] sm:$0xff] %vm321_vm1, %v305_v38  ;;  %v263_v40 = vpop.f32.mrb[2].mxu1  ;;  %v144_v41 = vpop.f32.mrb[3].mxu0 }
  0xf8   :  { %v306_v42 = vmul.f32 %v263_v40, %v142_v39  ;;  %v265_v43 = vpop.f32.mrb[3].mxu1 }
  0xf9   :  { %v307_v44 = vmul.f32 %v265_v43, %v144_v41 }
  0xfa   :  { %323 = vst [vmem:[#allocation5 + $0x10] sm:$0xff] %v306_v42  ;;  %v148_v45 = vpop.f32.mrb[4].mxu0 }
  0xfb   :  { %324 = vst.msk [vmem:[#allocation5 + $0x18] sm:$0xff] %vm321_vm1, %v307_v44  ;;  %v269_v46 = vpop.f32.mrb[4].mxu1  ;;  %v150_v47 = vpop.f32.mrb[5].mxu0 }
  0xfc   :  { %v308_v48 = vmul.f32 %v269_v46, %v148_v45  ;;  %v271_v49 = vpop.f32.mrb[5].mxu1 }
  0xfd   :  { %v309_v50 = vmul.f32 %v271_v49, %v150_v47 }
  0xfe   :  { %325 = vst [vmem:[#allocation5 + $0x20] sm:$0xff] %v308_v48  ;;  %v154_v51 = vpop.f32.mrb[6].mxu0 }
  0xff   :  { %326 = vst.msk [vmem:[#allocation5 + $0x28] sm:$0xff] %vm321_vm1, %v309_v50  ;;  %v275_v52 = vpop.f32.mrb[6].mxu1  ;;  %v156_v53 = vpop.f32.mrb[7].mxu0 }
 0x100   :  { %v310_v54 = vmul.f32 %v275_v52, %v154_v51  ;;  %v277_v55 = vpop.f32.mrb[7].mxu1 }
 0x101   :  { %v311_v56 = vmul.f32 %v277_v55, %v156_v53 }
 0x102   :  { %327 = vst [vmem:[#allocation5 + $0x30] sm:$0xff] %v310_v54  ;;  %v160_v57 = vpop.f32.mrb[8].mxu0 }
 0x103   :  { %328 = vst.msk [vmem:[#allocation5 + $0x38] sm:$0xff] %vm321_vm1, %v311_v56  ;;  %v281_v58 = vpop.f32.mrb[8].mxu1  ;;  %v162_v59 = vpop.f32.mrb[9].mxu0 }
 0x104   :  { %v312_v60 = vmul.f32 %v281_v58, %v160_v57  ;;  %v283_v61 = vpop.f32.mrb[9].mxu1 }
 0x105   :  { %v313_v62 = vmul.f32 %v283_v61, %v162_v59 }
 0x106   :  { %329 = vst [vmem:[#allocation5 + $0x40] sm:$0xff] %v312_v60  ;;  %v166_v63 = vpop.f32.mrb[10].mxu0 }
 0x107   :  { %330 = vst.msk [vmem:[#allocation5 + $0x48] sm:$0xff] %vm321_vm1, %v313_v62  ;;  %v287_v0 = vpop.f32.mrb[10].mxu1  ;;  %v168_v1 = vpop.f32.mrb[11].mxu0 }
 0x108   :  { %v314_v2 = vmul.f32 %v287_v0, %v166_v63  ;;  %v289_v3 = vpop.f32.mrb[11].mxu1 }
 0x109   :  { %v315_v4 = vmul.f32 %v289_v3, %v168_v1 }
 0x10a   :  { %331 = vst [vmem:[#allocation5 + $0x50] sm:$0xff] %v314_v2  ;;  %v172_v5 = vpop.f32.mrb[12].mxu0 }
 0x10b   :  { %332 = vst.msk [vmem:[#allocation5 + $0x58] sm:$0xff] %vm321_vm1, %v315_v4  ;;  %v293_v6 = vpop.f32.mrb[12].mxu1  ;;  %v174_v7 = vpop.f32.mrb[13].mxu0 }
 0x10c   :  { %v316_v8 = vmul.f32 %v293_v6, %v172_v5  ;;  %v295_v9 = vpop.f32.mrb[13].mxu1 }
 0x10d   :  { %v317_v10 = vmul.f32 %v295_v9, %v174_v7 }
 0x10e   :  { %333 = vst [vmem:[#allocation5 + $0x60] sm:$0xff] %v316_v8  ;;  %v178_v11 = vpop.f32.mrb[14].mxu0 }
 0x10f   :  { %334 = vst.msk [vmem:[#allocation5 + $0x68] sm:$0xff] %vm321_vm1, %v317_v10  ;;  %v299_v12 = vpop.f32.mrb[14].mxu1  ;;  %v180_v13 = vpop.f32.mrb[15].mxu0 }
 0x110   :  { %v318_v14 = vmul.f32 %v299_v12, %v178_v11  ;;  %v301_v15 = vpop.f32.mrb[15].mxu1 }
 0x111   :  { %v319_v16 = vmul.f32 %v301_v15, %v180_v13 }
 0x112   :  { %335 = vst [vmem:[#allocation5 + $0x70] sm:$0xff] %v318_v14 }
 0x113   :  { %336 = vst.msk [vmem:[#allocation5 + $0x78] sm:$0xff] %vm321_vm1, %v319_v16 }
 0x114   :  { %424 = shalt.err (!%p421_p12)
}
 0x115   :  { %s425_s7 = scalar_lea.hbm %s585_s3, 2048 }
 0x116   :  { %p426_p13 = scmp.ne.s32.totalorder %s585_s3, %s425_s7  ;;  %p429_p0 = scmp.lt.u32.totalorder %s425_s7, %s585_s3 }
 0x118   :  { %p431_p1 = pnand %p429_p0, %p426_p13 }
 0x11a   :  { %434 = shalt.err (!%p431_p1)
}
 0x11b   :  { %348 = dma.vmem_to_hbm [thread:$0]  %s343_s2, 2048, %s585_s3, [#allocation4], %s440_s22, %s440_s22, %s441_s23  }
 0x11c   :  { %437 = dma.done.wait [#allocation4], 2048  }
 0x11d   :  { %438 = vsyncadd [#allocation4], 4294965248 }
 0x11e   :  { %352 = vsyncpa [#allocation3], 1 }
 0x11f   :  { %353 = vsyncpa [#allocation4], 1 }

</bundles_post_ra>
